<compile_context>
chip_gen: v7x
topology: tpu7x:2x2x1
jax: 0.10.0
libtpu: 0.0.40
codegen_flags: <defaults>
</compile_context>

<pallas_src>
import functools

import jax
import jax.numpy as jnp
from jax import lax
from jax.experimental import pallas as pl
from jax.experimental.pallas import tpu as pltpu


# -----------------------------------------------------------------------------
# Prologue: fused Q/K/V 1x1-conv projection, computed once per token tile.
# Weight rows are ordered [Q (padded to Cp); K (padded to Cp); V (C)] so all
# result slices start at sublane-aligned offsets.
# -----------------------------------------------------------------------------
def _proj_kernel(Cp,
                 x_ref,          # (1, C, TP) f32
                 w_ref,          # (2*Cp + C, C) bf16
                 b_ref,          # (2*Cp + C, 1) f32
                 q_ref,          # (1, Cp, TP) bf16
                 k_ref,          # (1, Cp, TP) bf16
                 v_ref):         # (1, C,  TP) bf16
    x_bf = x_ref[0].astype(jnp.bfloat16)                               # (C, TP)
    qkv = jnp.dot(w_ref[...], x_bf,
                  preferred_element_type=jnp.float32) + b_ref[...]     # (2Cp+C, TP)
    q_ref[0] = qkv[:Cp, :].astype(jnp.bfloat16)
    k_ref[0] = qkv[Cp:2 * Cp, :].astype(jnp.bfloat16)
    v_ref[0] = qkv[2 * Cp:, :].astype(jnp.bfloat16)


# -----------------------------------------------------------------------------
# Flash-tiled attention + gamma-scaled residual.
# grid = (B, N//TQ, N//TK); kv axis innermost ("arbitrary" reduction).
# -----------------------------------------------------------------------------
def _flash_kernel(use_bf16_exp,
                  gamma_ref,        # SMEM (1,) f32
                  xres_ref,         # (1, C, TQ) f32   residual tile of x
                  q_ref,            # (1, Cp, TQ) bf16
                  k_ref,            # (1, Cp, TK) bf16
                  v_ref,            # (1, C,  TK) bf16
                  o_ref,            # (1, C, TQ) f32
                  m_scr,            # (1, TQ) f32   running max
                  l_scr,            # (1, TQ) f32   running denominator
                  acc_scr):         # (C, TQ) f32   channels-first accumulator
    ki = pl.program_id(2)
    nk = pl.num_programs(2)

    @pl.when(ki == 0)
    def _init():
        m_scr[...] = jnp.full_like(m_scr, -jnp.inf)
        l_scr[...] = jnp.zeros_like(l_scr)
        acc_scr[...] = jnp.zeros_like(acc_scr)

    # energy^T[j, i] = k_j . q_i  (contraction over padded query channels).
    s_t = lax.dot_general(k_ref[0], q_ref[0], (((0,), (0,)), ((), ())),
                          preferred_element_type=jnp.float32)           # (TK, TQ)

    m_prev = m_scr[...]
    m_new = jnp.maximum(m_prev, jnp.max(s_t, axis=0, keepdims=True))    # (1, TQ)
    alpha = jnp.exp(m_prev - m_new)                                     # (1, TQ)

    if use_bf16_exp:
        # v6e/v7x: exp is the only EUP work and binds before the MXU; p is cast
        # to bf16 for the MXU anyway, so do the exp in bf16 and sum in f32.
        p = jnp.exp((s_t - m_new).astype(jnp.bfloat16))                 # (TK, TQ) bf16
        p_sum = jnp.sum(p.astype(jnp.float32), axis=0, keepdims=True)
    else:
        p32 = jnp.exp(s_t - m_new)                                      # (TK, TQ) f32
        p_sum = jnp.sum(p32, axis=0, keepdims=True)
        p = p32.astype(jnp.bfloat16)

    l_scr[...] = alpha * l_scr[...] + p_sum
    # acc[c, i] += sum_j v[c, j] * p[j, i]  — plain "nn" matmul, no transposes.
    acc_scr[...] = alpha * acc_scr[...] + jnp.dot(
        v_ref[0], p, preferred_element_type=jnp.float32)                # (C, TQ)
    m_scr[...] = m_new

    @pl.when(ki == nk - 1)
    def _finalize():
        inv_l = pl.reciprocal(l_scr[...], approx=True)                  # (1, TQ)
        # Lane-dense store (tokens on lanes); residual uses exact f32 x.
        o_ref[0] = acc_scr[...] * (gamma_ref[0] * inv_l) + xres_ref[0]


# -----------------------------------------------------------------------------
# Tiling / VMEM helpers
# -----------------------------------------------------------------------------
def _round_up(v, m):
    return ((v + m - 1) // m) * m


def _pick_tile(n, cap):
    """Largest tile <= cap that divides n and satisfies the lane constraint
    (multiple of 128, or the full extent)."""
    if n <= cap:
        return n
    t = (min(cap, n) // 128) * 128
    while t >= 128:
        if n % t == 0:
            return t
        t -= 128
    # TODO(synk): ragged N (not a multiple of 128) falls back to one full-N
    # tile; for very large ragged N this may exceed the v7x VMEM budget.
    return n


def _vmem_capacity_bytes():
    try:
        return int(pltpu.get_tpu_info().vmem_capacity_bytes)
    except Exception:
        return 64 * 1024 * 1024   # conservative fallback (v7x per-TC VMEM)


def _use_bf16_exp():
    try:
        kind = jax.devices()[0].device_kind.lower()
    except Exception:
        return False
    # v5e (and older) have no bf16 EUP -> keep the exp in f32 there.
    return ("v6" in kind) or ("v7" in kind)


def _flash_vmem_est(C, Cp, tq, tk):
    db = 2  # double-buffered pipelined inputs/outputs
    return (C * tq * 4 * db            # residual x tile (f32)
            + Cp * tq * 2 * db         # Q tile (bf16)
            + Cp * tk * 2 * db         # K tile (bf16)
            + C * tk * 2 * db          # V tile (bf16)
            + C * tq * 4 * db          # output tile (f32)
            + C * tq * 4 + 2 * tq * 4  # acc + m/l scratch
            + tk * tq * 6)             # s_t (f32) + p (bf16) intermediates


def _choose_tiles(C, Cp, N, vmem_cap, tq_cap, tk_cap):
    """Largest (TQ, TK) under caps whose estimated VMEM footprint fits the budget."""
    budget = max(vmem_cap // 2, 8 * 1024 * 1024)
    tq_cands = [tq_cap] + [c for c in (256, 128) if c < tq_cap]
    tk_cands = [tk_cap] + [c for c in (1024, 512, 256, 128) if c < tk_cap]
    fallback = None
    for tqc in tq_cands:
        for tkc in tk_cands:
            tq, tk = _pick_tile(N, tqc), _pick_tile(N, tkc)
            if fallback is None:
                fallback = (tq, tk)
            if _flash_vmem_est(C, Cp, tq, tk) <= budget:
                return tq, tk
    return fallback


# -----------------------------------------------------------------------------
# Wrapper
# -----------------------------------------------------------------------------
def self_attention(x_nchw, params, *, tq_cap=512, tk_cap=2048, tp_cap=512):
    """x_nchw: (B, C, W, H) float32.  Returns (B, C, W, H) float32."""
    B, C, W, H = x_nchw.shape
    N = W * H
    Cq = C // 8
    Cp = max(8, _round_up(Cq, 8))          # sublane-aligned q/k channel count

    x_bcn = x_nchw.reshape(B, C, N)        # f32, pure reshape — no cast pass

    def pad_rows(a, rows):
        if a.shape[0] >= rows:
            return a
        pad = jnp.zeros((rows - a.shape[0],) + a.shape[1:], a.dtype)
        return jnp.concatenate([a, pad], axis=0)

    wq = pad_rows(params["wq"], Cp)
    bq = pad_rows(params["bq"], Cp)
    wk = pad_rows(params["wk"], Cp)
    bk = pad_rows(params["bk"], Cp)
    w_fused = jnp.concatenate([wq, wk, params["wv"]], axis=0).astype(jnp.bfloat16)  # (2Cp+C, C)
    b_fused = jnp.concatenate([bq, bk, params["bv"]], axis=0).astype(jnp.float32)   # (2Cp+C, 1)
    gamma = params["gamma"].astype(jnp.float32)                                     # (1,)

    vmem_cap = _vmem_capacity_bytes()
    Crows = 2 * Cp + C

    # --- Prologue: Q/K/V projection once per token -------------------------
    TP = _pick_tile(N, tp_cap)
    q_bcn, k_bcn, v_bcn = pl.pallas_call(
        functools.partial(_proj_kernel, Cp),
        out_shape=(jax.ShapeDtypeStruct((B, Cp, N), jnp.bfloat16),
                   jax.ShapeDtypeStruct((B, Cp, N), jnp.bfloat16),
                   jax.ShapeDtypeStruct((B, C, N), jnp.bfloat16)),
        grid=(B, N // TP),
        in_specs=[
            pl.BlockSpec((1, C, TP), lambda b, n: (b, 0, n)),     # x (f32)
            pl.BlockSpec((Crows, C), lambda b, n: (0, 0)),        # fused weights
            pl.BlockSpec((Crows, 1), lambda b, n: (0, 0)),        # fused biases
        ],
        out_specs=(
            pl.BlockSpec((1, Cp, TP), lambda b, n: (b, 0, n)),    # Q
            pl.BlockSpec((1, Cp, TP), lambda b, n: (b, 0, n)),    # K
            pl.BlockSpec((1, C, TP), lambda b, n: (b, 0, n)),     # V
        ),
        compiler_params=pltpu.CompilerParams(
            dimension_semantics=("parallel", "parallel"),
            vmem_limit_bytes=int(min(0.85 * vmem_cap, 64 * 1024 * 1024))),
    )(x_bcn, w_fused, b_fused)

    # --- Flash-tiled attention + gamma-scaled residual ----------------------
    TQ, TK = _choose_tiles(C, Cp, N, vmem_cap, tq_cap, tk_cap)
    est = _flash_vmem_est(C, Cp, TQ, TK)
    vmem_limit = int(min(0.85 * vmem_cap,
                         max(2 * est + 16 * 1024 * 1024, 32 * 1024 * 1024)))

    out_bcn = pl.pallas_call(
        functools.partial(_flash_kernel, _use_bf16_exp()),
        out_shape=jax.ShapeDtypeStruct((B, C, N), jnp.float32),
        grid=(B, N // TQ, N // TK),
        in_specs=[
            pl.BlockSpec(memory_space=pltpu.MemorySpace.SMEM),            # gamma
            pl.BlockSpec((1, C, TQ), lambda b, qi, ki: (b, 0, qi)),       # x residual (f32)
            pl.BlockSpec((1, Cp, TQ), lambda b, qi, ki: (b, 0, qi)),      # Q tile
            pl.BlockSpec((1, Cp, TK), lambda b, qi, ki: (b, 0, ki)),      # K tile
            pl.BlockSpec((1, C, TK), lambda b, qi, ki: (b, 0, ki)),       # V tile
        ],
        out_specs=pl.BlockSpec((1, C, TQ), lambda b, qi, ki: (b, 0, qi)),
        scratch_shapes=[
            pltpu.VMEM((1, TQ), jnp.float32),     # running max
            pltpu.VMEM((1, TQ), jnp.float32),     # running denominator
            pltpu.VMEM((C, TQ), jnp.float32),     # channels-first accumulator
        ],
        compiler_params=pltpu.CompilerParams(
            dimension_semantics=("parallel", "parallel", "arbitrary"),
            vmem_limit_bytes=vmem_limit),
    )(gamma, x_bcn, q_bcn, k_bcn, v_bcn)

    return out_bcn.reshape(B, C, W, H)


# -----------------------------------------------------------------------------
# Reference + test
# -----------------------------------------------------------------------------
def _reference(x, params):
    """Pure-JAX f32 reference mirroring the PyTorch forward exactly."""
    B, C, W, H = x.shape
    N = W * H
    xf = x.reshape(B, C, N)                                                # (B, C, N)
    q = jnp.einsum("oc,bcn->bon", params["wq"], xf) + params["bq"][None]   # (B, Cq, N)
    k = jnp.einsum("oc,bcn->bon", params["wk"], xf) + params["bk"][None]   # (B, Cq, N)
    v = jnp.einsum("oc,bcn->bon", params["wv"], xf) + params["bv"][None]   # (B, C,  N)
    energy = jnp.einsum("bcn,bcm->bnm", q, k)                              # (B, N, N)
    attention = jax.nn.softmax(energy, axis=-1)
    out = jnp.einsum("bcn,bmn->bcm", v, attention)                         # (B, C, N)
    return params["gamma"][0] * out.reshape(B, C, W, H) + x


def make_params(key, C):
    Cq = C // 8
    ks = jax.random.split(key, 7)
    s = 0.1
    return {
        "wq": s * jax.random.normal(ks[0], (Cq, C), jnp.float32),
        "bq": s * jax.random.normal(ks[1], (Cq, 1), jnp.float32),
        "wk": s * jax.random.normal(ks[2], (Cq, C), jnp.float32),
        "bk": s * jax.random.normal(ks[3], (Cq, 1), jnp.float32),
        "wv": s * jax.random.normal(ks[4], (C, C), jnp.float32),
        "bv": s * jax.random.normal(ks[5], (C, 1), jnp.float32),
        # nn.Parameter(torch.zeros(1)) in __init__; nonzero here so the
        # attention path actually contributes to the output under test.
        "gamma": jnp.array([0.5], jnp.float32),
    }


if __name__ == "__main__":
    key = jax.random.PRNGKey(0)
    kx, kp = jax.random.split(key)

    # Small config consistent with the module (C divisible by 8).
    B, C, W, H = 2, 32, 8, 8
    x = jax.random.normal(kx, (B, C, W, H), jnp.float32)
    params = make_params(kp, C)

    out = jax.block_until_ready(self_attention(x, params))
    ref = jax.block_until_ready(_reference(x, params))
    assert out.shape == (B, C, W, H)
    err = float(jnp.max(jnp.abs(out - ref)))
    # bf16 MXU operands -> relaxed tolerance vs the f32 reference.
    assert jnp.allclose(out, ref, rtol=2e-2, atol=2e-2), err

    # Exercise the multi-tile online-softmax path (2 query x 2 kv tiles).
    B2, C2, W2, H2 = 2, 32, 16, 16
    x2 = jax.random.normal(kx, (B2, C2, W2, H2), jnp.float32)
    out2 = jax.block_until_ready(self_attention(x2, params, tq_cap=128, tk_cap=128))
    ref2 = jax.block_until_ready(_reference(x2, params))
    err2 = float(jnp.max(jnp.abs(out2 - ref2)))
    assert jnp.allclose(out2, ref2, rtol=2e-2, atol=2e-2), err2

    print("KERNEL_OK")
</pallas_src>

<mosaic_0001>
module attributes {stable_mosaic.version = 11 : i64} {
  func.func @_proj_kernel(%arg0: i32, %arg1: i32, %arg2: memref<1x32x64xf32, #tpu.memory_space<vmem>>, %arg3: memref<48x32xbf16, #tpu.memory_space<vmem>>, %arg4: memref<48x1xf32, #tpu.memory_space<vmem>>, %arg5: memref<1x8x64xbf16, #tpu.memory_space<vmem>>, %arg6: memref<1x8x64xbf16, #tpu.memory_space<vmem>>, %arg7: memref<1x32x64xbf16, #tpu.memory_space<vmem>>) attributes {dimension_semantics = [#tpu.dimension_semantics<parallel>, #tpu.dimension_semantics<parallel>], iteration_bounds = array<i64: 2, 1>, scalar_prefetch = 0 : i64, scratch_operands = 0 : i64, tpu.core_type = #tpu.core_type<tc>, window_params = [{transform_indices = @transform_0, window_bounds = array<i64: 1, 32, 64>}, {pipeline_mode = #tpu.pipeline_mode<synchronous>, transform_indices = @transform_1, window_bounds = array<i64: 48, 32>}, {pipeline_mode = #tpu.pipeline_mode<synchronous>, transform_indices = @transform_2, window_bounds = array<i64: 48, 1>}, {transform_indices = @transform_3, window_bounds = array<i64: 1, 8, 64>}, {transform_indices = @transform_4, window_bounds = array<i64: 1, 8, 64>}, {transform_indices = @transform_5, window_bounds = array<i64: 1, 32, 64>}]} {
    %c0 = arith.constant 0 : index
    %c0_0 = arith.constant 0 : index
    %c0_1 = arith.constant 0 : index
    %0 = vector.load %arg2[%c0, %c0_0, %c0_1] : memref<1x32x64xf32, #tpu.memory_space<vmem>>, vector<1x32x64xf32>
    %1 = vector.shape_cast %0 : vector<1x32x64xf32> to vector<32x64xf32>
    %2 = arith.truncf %1 : vector<32x64xf32> to vector<32x64xbf16>
    %c0_2 = arith.constant 0 : index
    %c0_3 = arith.constant 0 : index
    %3 = vector.load %arg3[%c0_2, %c0_3] : memref<48x32xbf16, #tpu.memory_space<vmem>>, vector<48x32xbf16>
    %cst = arith.constant dense<0.000000e+00> : vector<48x64xf32>
    %4 = tpu.matmul %3, %2, %cst {dimension_numbers = #tpu.dot_dimension_numbers<[1], [0], [0], [1], [0, 0, 1, 1], [], []>} : vector<48x32xbf16>, vector<32x64xbf16>, vector<48x64xf32> -> vector<48x64xf32>
    %c0_4 = arith.constant 0 : index
    %c0_5 = arith.constant 0 : index
    %5 = vector.load %arg4[%c0_4, %c0_5] : memref<48x1xf32, #tpu.memory_space<vmem>>, vector<48x1xf32>
    %6 = vector.broadcast %5 : vector<48x1xf32> to vector<48x64xf32>
    %7 = arith.addf %4, %6 : vector<48x64xf32>
    %8 = vector.extract_strided_slice %7 {offsets = [0, 0], sizes = [8, 64], strides = [1, 1]} : vector<48x64xf32> to vector<8x64xf32>
    %9 = arith.truncf %8 : vector<8x64xf32> to vector<8x64xbf16>
    %c0_6 = arith.constant 0 : index
    %c0_7 = arith.constant 0 : index
    %c0_8 = arith.constant 0 : index
    %10 = vector.load %arg5[%c0_6, %c0_7, %c0_8] : memref<1x8x64xbf16, #tpu.memory_space<vmem>>, vector<1x8x64xbf16>
    %11 = vector.shape_cast %10 : vector<1x8x64xbf16> to vector<8x64xbf16>
    %12 = vector.shape_cast %9 : vector<8x64xbf16> to vector<1x8x64xbf16>
    tpu.vector_store %arg5[%c0_6, %c0_7, %c0_8], %12 {strides = array<i32>} : memref<1x8x64xbf16, #tpu.memory_space<vmem>>, vector<1x8x64xbf16>,
    %13 = vector.extract_strided_slice %7 {offsets = [8, 0], sizes = [8, 64], strides = [1, 1]} : vector<48x64xf32> to vector<8x64xf32>
    %14 = arith.truncf %13 : vector<8x64xf32> to vector<8x64xbf16>
    %c0_9 = arith.constant 0 : index
    %c0_10 = arith.constant 0 : index
    %c0_11 = arith.constant 0 : index
    %15 = vector.load %arg6[%c0_9, %c0_10, %c0_11] : memref<1x8x64xbf16, #tpu.memory_space<vmem>>, vector<1x8x64xbf16>
    %16 = vector.shape_cast %15 : vector<1x8x64xbf16> to vector<8x64xbf16>
    %17 = vector.shape_cast %14 : vector<8x64xbf16> to vector<1x8x64xbf16>
    tpu.vector_store %arg6[%c0_9, %c0_10, %c0_11], %17 {strides = array<i32>} : memref<1x8x64xbf16, #tpu.memory_space<vmem>>, vector<1x8x64xbf16>,
    %18 = vector.extract_strided_slice %7 {offsets = [16, 0], sizes = [32, 64], strides = [1, 1]} : vector<48x64xf32> to vector<32x64xf32>
    %19 = arith.truncf %18 : vector<32x64xf32> to vector<32x64xbf16>
    %c0_12 = arith.constant 0 : index
    %c0_13 = arith.constant 0 : index
    %c0_14 = arith.constant 0 : index
    %20 = vector.load %arg7[%c0_12, %c0_13, %c0_14] : memref<1x32x64xbf16, #tpu.memory_space<vmem>>, vector<1x32x64xbf16>
    %21 = vector.shape_cast %20 : vector<1x32x64xbf16> to vector<32x64xbf16>
    %22 = vector.shape_cast %19 : vector<32x64xbf16> to vector<1x32x64xbf16>
    tpu.vector_store %arg7[%c0_12, %c0_13, %c0_14], %22 {strides = array<i32>} : memref<1x32x64xbf16, #tpu.memory_space<vmem>>, vector<1x32x64xbf16>,
    return
  }
  func.func @transform_0(%arg0: i32, %arg1: i32) -> (i32, i32, i32) {
    %c0_i32 = arith.constant 0 : i32
    %c0_i32_0 = arith.constant 0 : i32
    return %arg0, %c0_i32, %arg1 : i32, i32, i32
  }
  func.func @transform_1(%arg0: i32, %arg1: i32) -> (i32, i32) {
    %c0_i32 = arith.constant 0 : i32
    %c0_i32_0 = arith.constant 0 : i32
    %c0_i32_1 = arith.constant 0 : i32
    return %c0_i32, %c0_i32_0 : i32, i32
  }
  func.func @transform_2(%arg0: i32, %arg1: i32) -> (i32, i32) {
    %c0_i32 = arith.constant 0 : i32
    %c0_i32_0 = arith.constant 0 : i32
    %c0_i32_1 = arith.constant 0 : i32
    return %c0_i32, %c0_i32_0 : i32, i32
  }
  func.func @transform_3(%arg0: i32, %arg1: i32) -> (i32, i32, i32) {
    %c0_i32 = arith.constant 0 : i32
    %c0_i32_0 = arith.constant 0 : i32
    return %arg0, %c0_i32, %arg1 : i32, i32, i32
  }
  func.func @transform_4(%arg0: i32, %arg1: i32) -> (i32, i32, i32) {
    %c0_i32 = arith.constant 0 : i32
    %c0_i32_0 = arith.constant 0 : i32
    return %arg0, %c0_i32, %arg1 : i32, i32, i32
  }
  func.func @transform_5(%arg0: i32, %arg1: i32) -> (i32, i32, i32) {
    %c0_i32 = arith.constant 0 : i32
    %c0_i32_0 = arith.constant 0 : i32
    return %arg0, %c0_i32, %arg1 : i32, i32, i32
  }
}

</mosaic_0001>

<bundles_post_ra>
// kernel: tpu_custom_call.1
= control target key start
LH: loop header
LB: loop body
LE: loop exit
PB: predicated region body
PF: predicated region fallthrough
CT: control target
= control target key end

     0   :  { %s1169_s0 = inlined_call_operand.vmem [shape: f32[2,32,64], index: 0, kind: input, shape index: {}]   ;;  %s1170_s1 = inlined_call_operand.vmem [shape: bf16[48,32], index: 1, kind: input, shape index: {}]   ;;  %s1171_s2 = inlined_call_operand.vmem [shape: f32[48,1], index: 2, kind: input, shape index: {}]   ;;  %s1172_s3 = inlined_call_operand.hbm [shape: bf16[2,8,64], index: 3, kind: output, shape index: {0}]   ;;  %s1173_s4 = inlined_call_operand.hbm [shape: bf16[2,8,64], index: 4, kind: output, shape index: {1}]   ;;  %s1174_s5 = inlined_call_operand.hbm [shape: bf16[2,32,64], index: 5, kind: output, shape index: {2}]  }
   0x1   :  { %1176 = sst [smem:[#allocation9_spill]] %s1169_s0 }
   0x2   :  { %1177 = sst [smem:[#allocation10_spill]] %s1170_s1 }
   0x3   :  { %11 = vsyncpa [#allocation3], 0 }
   0x4   :  { %13 = vsyncpa [#allocation3 + $0x1], 0 }
   0x5   :  { %14 = vsyncpa [#allocation5], 0 }
   0x6   :  { %16 = vsyncpa [#allocation5 + $0x1], 0  ;;  %s933_s18 = smov 0   ;;  %s935_s19 = smov 0  }
   0x7   :  { %s937_s20 = smov 0   ;;  %s939_s21 = smov 0  }
   0x8   :  { %s941_s22 = smov 0   ;;  %s943_s23 = smov 0  }
   0x9 LB: > { %s620_s24 = sadd.s32 4294967295, %s893_s23   ;;  %s1175_s25 = sadd.s32 4294967294, %s893_s23   ;;  %s893_s23 = sphi %s943_s23, %s22_s23   ;;  %s889_s22 = sphi %s941_s22, %s1187_s22   ;;  %s885_s21 = sphi %s939_s21, %s1186_s21   ;;  %s881_s20 = sphi %s937_s20, %s1185_s20   ;;  %s877_s19 = sphi %s935_s19, %s1184_s19   ;;  %s873_s18 = sphi %s933_s18, %s1183_s18  }
   0xa   : > { %s34_s26 = sadd.s32 1, %s889_s22  ;;  %s113_s27 = sadd.s32 1, %s881_s20 }
   0xb   : > { %p36_p0 = scmp.ge.s32.totalorder %s34_s26, 2  ;;  %p123_p1 = scmp.ne.s32.totalorder %s881_s20, %s877_s19 }
   0xc   : > { %p124_p2 = scmp.eq.s32.totalorder %s620_s24, 1  ;;  %p129_p3 = scmp.ne.s32.totalorder %s877_s19, %s873_s18 }
   0xd   : > { %s1189_s26 = smov (%p36_p0, %s34_s26), 0  ;;  %p130_p5 = scmp.eq.s32.totalorder %s1175_s25, 1 }
   0xe   : > { %p975_p4 = por %p124_p2, %p123_p1  ;;  %s108_s29 = ssub.s32 %s889_s22, %s1189_s26 }
   0xf   : > { %p624_p6 = scmp.ge.s32.totalorder %s893_s23, 1  ;;  %p111_p7 = scmp.eq.s32.totalorder %s108_s29, 0 }
  0x10   : > { %p984_p8 = por %p130_p5, %p129_p3  ;;  %p221_p9 = scmp.lt.s32.totalorder %s893_s23, 3 }
  0x11   : > { %s990_s6 = scalar_select %p111_p7, %s881_s20, %s113_s27  }
  0x12   : > { %p222_p10 = pnand %p624_p6, %p221_p9 }
  0x13   : > { %p262_p11 = scmp.lt.s32.totalorder (!%p222_p10), %s885_s21, 1  ;;  %v895_v0 = vmov (!%p222_p10), 0.0   ;;  %vm896_vm0 = vmmov (!%p222_p10), 0   ;;  %v285_v1 = vld [vmem:[%s1171_s2 + $0x10] sm:$0xff] (!%p222_p10)  ;;  %v284_v2 = vld [vmem:[%s1171_s2 + $0x8] sm:$0xff] (!%p222_p10)  ;;  %v897_v3 = vmov (!%p222_p10), 0  }
  0x14   : > { %225 = sbr.rel (%p222_p10) target bundleno = 319 (0x13f), region = 32  ;;  %660 = vmatprep.subr.bf16.mxu0 (!%p222_p10), %v895_v0  ;;  %676 = vmatprep.subr.bf16.mxu1 (!%p222_p10), %v895_v0  ;;  %s1180_s0 = sld [smem:[#allocation9_spill]] (!%p222_p10)  ;;  %v286_v9 = vld [vmem:[%s1171_s2 + $0x18] sm:$0xff] (!%p222_p10)  ;;  %v283_v10 = vld [vmem:[%s1171_s2] sm:$0xff] (!%p222_p10)  ;;  %v288_v14 = vld [vmem:[%s1171_s2 + $0x28] sm:$0xff] (!%p222_p10)  ;;  %vm334_vm1 = vcmask (!%p222_p10), 261120  }
  0x15   : > { %664 = vmatprep.mubr.msk.bf16.mxu0 (!%p222_p10), %vm896_vm0, %v895_v0  ;;  %668 = vmatprep.mubr.msk.bf16.mxu1 (!%p222_p10), %vm896_vm0, %v895_v0  ;;  %s1181_s1 = sld [smem:[#allocation10_spill]] (!%p222_p10)  ;;  %v287_v15 = vld [vmem:[%s1171_s2 + $0x20] sm:$0xff] (!%p222_p10)  ;;  %s1028_s17 = sand.u32 (!%p222_p10), 1, %s877_s19   ;;  %vm402_vm2 = vcmask (!%p222_p10), 519168  }
  0x16   : > { %751 = vset.pattern.permute.xlu1 (!%p222_p10), %v897_v3  ;;  %750 = vset.pattern.permute.xlu0 (!%p222_p10), %v897_v3  ;;  %s627_s27 = sshll.u32 (!%p222_p10), %s1028_s17, 4  ;;  %s625_s29 = sshll.u32 (!%p222_p10), %s1028_s17, 2 }
  0x17   : > { %301 = vperm.xlu1 (!%p222_p10), %751, %v285_v1   ;;  %296 = vperm.xlu0 (!%p222_p10), %750, %v284_v2   ;;  %s247_s8 = scalar_lea.vmem (!%p222_p10), [#allocation2], %s625_s29  ;;  %s1035_s10 = sand.u32 (!%p222_p10), 1, %s620_s24  }
  0x18   : > { %s451_s9 = sshll.u32 (!%p222_p10), %s247_s8, 4  ;;  %s1037_s11 = scalar_lea.vmem (!%p222_p10), [#allocation4], %s625_s29  ;;  %s1045_s9 = int_to_ptr.vmem [resolvable:$true] %s451_s9 }
  0x19   : > { %s427_s13 = scalar_lea.sflag (!%p222_p10), [#allocation3], %s1028_s17  ;;  %s755_s14 = scalar_lea.vmem (!%p222_p10), %s1045_s9, 64 }
  0x1a   : > { %p756_p12 = scmp.ne.s32.totalorder (!%p222_p10), %s1045_s9, %s755_s14 }
  0x1b   : > { %s263_s7 = scalar_select %p262_p11, %s885_s21, 1  ;;  %v752_v12 = vld [vmem:[%s1181_s1] sm:$0xff]   ;;  %306 = vperm.xlu1 %751, %v286_v9   ;;  %291 = vperm.xlu0 %750, %v283_v10   ;;  %v753_v13 = vld [vmem:[%s1181_s1 + $0x8] sm:$0xff]   ;;  %v754_v16 = vld [vmem:[%s1181_s1 + $0x10] sm:$0xff]  }
  0x1c   : > { %p757_p13 = pnand %p756_p12, %p975_p4 }
  0x1d   : > { %s649_s12 = sshll.u32 %s263_s7, 5  ;;  %s643_s7 = sshll.u32 %s885_s21, 6 }
  0x1e   : > { %s269_s15 = scalar_lea.vmem %s1180_s0, %s649_s12  ;;  %s465_s12 = sshll.u32 %s1037_s11, 4  ;;  %s1056_s12 = int_to_ptr.vmem [resolvable:$true] %s465_s12 }
  0x1f   : > { %v271_v4 = vld [vmem:[%s269_s15] sm:$0xff]  ;;  %v272_v5 = vld [vmem:[%s269_s15 + $0x8] sm:$0xff]  ;;  %v273_v6 = vld [vmem:[%s269_s15 + $0x10] sm:$0xff]  ;;  %316 = vperm.xlu1 %751, %v288_v14   ;;  %311 = vperm.xlu0 %750, %v287_v15   ;;  %s1043_s24 = scalar_lea.hbm %s1172_s3, %s643_s7  ;;  %s1054_s25 = scalar_lea.hbm %s1173_s4, %s643_s7 }
  0x20   : > { %v275_v7 = vpack.c.bf16 %v272_v5, %v271_v4  ;;  %v274_v8 = vld [vmem:[%s269_s15 + $0x18] sm:$0xff]  ;;  %s1047_s15 = scalar_lea.vmem [#allocation6], %s627_s27  ;;  %p758_p0 = pneg %p757_p13 }
  0x21   : > { %v276_v11 = vpack.c.bf16 %v274_v8, %v273_v6  ;;  %s898_s27 = smov [#allocation2]  }
  0x22   : > { %661 = vmatpush3.bf16.msra.mxu0 %v275_v7  ;;  %678 = vmatpush3.bf16.msra.mxu1 %v275_v7  ;;  %s759_s0 = sshll.u32 %s898_s27, 4  ;;  %s760_s0 = int_to_ptr.vmem [resolvable:$false] %s759_s0 }
  0x23   : > { %662 = vmatprep.subr.bf16.mxu0 %v895_v0  ;;  %677 = vmatprep.subr.bf16.mxu1 %v895_v0  ;;  %s761_s1 = scalar_lea.vmem %s760_s0, 128  ;;  %p762_p1 = scmp.lt.s32.totalorder %s1045_s9, %s760_s0 }
  0x24   : > { %p763_p2 = scmp.lt.s32.totalorder %s761_s1, %s755_s14 }
  0x26   : > { %663 = vmatpush3.bf16.msra.mxu0 %v276_v11  ;;  %679 = vmatpush3.bf16.msra.mxu1 %v276_v11  ;;  %p764_p3 = por %p763_p2, %p762_p1 }
  0x28   : > { %p765_p5 = pnand %p764_p3, %p758_p0 }
  0x29   : > { %665 = vmatmul.mubr.msk.bf16.vlgmr.msra.gmra.mrb[0].mxu0 %vm334_vm1, %v752_v12  ;;  %669 = vmatmul.mubr.msk.bf16.vlgmr.msra.gmra.mrb[0].mxu1 %vm334_vm1, %v753_v13 }
  0x2a   : > { %672 = vmatprep.mubr.msk.bf16.mxu1 %vm896_vm0, %v895_v0 }
  0x31   : > { %673 = vmatmul.mubr.msk.bf16.gmra.mrb[4].mxu1 %vm334_vm1, %v754_v16 }
  0x96   : > { %v302_v17 = vpop.permute.xlu1 %301  ;;  %v297_v18 = vpop.permute.xlu0 %296 }
  0x9a   : > { %v307_v19 = vpop.permute.xlu1 %306  ;;  %v292_v20 = vpop.permute.xlu0 %291 }
  0xfc   : > { %v378_v21 = vpop.f32.mrb[0].mxu0  ;;  %v386_v22 = vpop.f32.mrb[0].mxu1 }
  0xfd   : > { %v379_v23 = vadd.f32 %v378_v21, %v292_v20  ;;  %v387_v24 = vadd.f32 %v386_v22, %v302_v17  ;;  %v666_v25 = vpop.f32.mrb[1].mxu0  ;;  %v670_v26 = vpop.f32.mrb[1].mxu1 }
  0xfe   : > { %v381_v27 = vpop.f32.mrb[2].mxu0  ;;  %v389_v28 = vpop.f32.mrb[2].mxu1 }
  0xff   : > { %v401_v29 = vpack.c.bf16 %v379_v23, %v379_v23  ;;  %v650_v30 = vpack.c.bf16 %v387_v24, %v387_v24  ;;  %v382_v31 = vadd.f32 %v381_v27, %v297_v18  ;;  %v390_v32 = vadd.f32 %v389_v28, %v307_v19  ;;  %v671_v33 = vpop.f32.mrb[3].mxu1  ;;  %v667_v34 = vpop.f32.mrb[3].mxu0 }
 0x101   : > { %422 = vst.msk [vmem:[%s1047_s15] sm:$0xf] %vm402_vm2, %v650_v30  ;;  %v404_v35 = vpack.c.bf16 %v382_v31, %v382_v31  ;;  %v651_v36 = vpack.c.bf16 %v390_v32, %v390_v32  ;;  %403 = vst.msk [vmem:[%s247_s8] sm:$0xf] %vm402_vm2, %v401_v29 }
 0x102   : > { %768 = shalt.err (!%p765_p5)
}
 0x103   : > { %s769_s17 = scalar_lea.hbm %s1043_s24, 64  ;;  %s773_s16 = scalar_lea.hbm %s1172_s3, 128 }
 0x104   : > { %p770_p6 = scmp.ne.s32.totalorder %s1043_s24, %s769_s17  ;;  %p774_p10 = scmp.lt.u32.totalorder %s1043_s24, %s1172_s3 }
 0x105   : > { %p775_p11 = scmp.lt.u32.totalorder %s773_s16, %s769_s17  ;;  %p777_p13 = scmp.lt.u32.totalorder %s769_s17, %s1043_s24 }
 0x106   : > { %p771_p7 = pnand %p770_p6, %p975_p4 }
 0x107   : > { %p776_p12 = por %p775_p11, %p774_p10 }
 0x108   : > { %p772_p9 = pneg %p771_p7 }
 0x109   : > { %p778_p0 = por %p777_p13, %p776_p12 }
 0x10b   : > { %p779_p1 = pnand %p778_p0, %p772_p9 }
 0x10d   : > { %782 = shalt.err (!%p779_p1)
}
 0x10e   : > { %680 = dma.vmem_to_hbm [thread:$0]  (%p975_p4), %s1045_s9, 64, %s1043_s24, %s427_s13   ;;  %423 = vst.msk [vmem:[%s1047_s15 + $0x4] sm:$0xf] %vm402_vm2, %v651_v36  ;;  %405 = vst.msk [vmem:[%s1037_s11] sm:$0xf] %vm402_vm2, %v404_v35  ;;  %v312_v37 = vpop.permute.xlu0 %311  ;;  %v394_v38 = vpop.f32.mrb[4].mxu1 }
 0x10f   : > { %s432_s1 = scalar_lea.sflag [#allocation5], %s1035_s10  ;;  %s783_s14 = scalar_lea.vmem %s1056_s12, 64 }
 0x110   : > { %p784_p2 = scmp.ne.s32.totalorder %s1056_s12, %s783_s14  ;;  %s899_s27 = smov [#allocation4]  }
 0x111   : > { %s787_s17 = sshll.u32 %s899_s27, 4  ;;  %s788_s17 = int_to_ptr.vmem [resolvable:$false] %s787_s17 }
 0x112   : > { %p785_p3 = pnand %p784_p2, %p975_p4  ;;  %s789_s7 = scalar_lea.vmem %s788_s17, 128 }
 0x113   : > { %p790_p6 = scmp.lt.s32.totalorder %s1056_s12, %s788_s17  ;;  %p791_p7 = scmp.lt.s32.totalorder %s789_s7, %s783_s14 }
 0x114   : > { %p786_p5 = pneg %p785_p3 }
 0x115   : > { %p792_p9 = por %p791_p7, %p790_p6 }
 0x117   : > { %p793_p10 = pnand %p792_p9, %p786_p5 }
 0x119   : > { %796 = shalt.err (!%p793_p10)
}
 0x11a   : > { %s797_s9 = scalar_lea.hbm %s1054_s25, 64  ;;  %s801_s13 = scalar_lea.hbm %s1173_s4, 128 }
 0x11b   : > { %p798_p11 = scmp.ne.s32.totalorder %s1054_s25, %s797_s9  ;;  %p802_p0 = scmp.lt.u32.totalorder %s1054_s25, %s1173_s4 }
 0x11c   : > { %p803_p1 = scmp.lt.u32.totalorder %s801_s13, %s797_s9  ;;  %p805_p3 = scmp.lt.u32.totalorder %s797_s9, %s1054_s25 }
 0x11d   : > { %p799_p12 = pnand %p798_p11, %p975_p4 }
 0x11e   : > { %p804_p2 = por %p803_p1, %p802_p0 }
 0x11f   : > { %p800_p13 = pneg %p799_p12 }
 0x120   : > { %p806_p5 = por %p805_p3, %p804_p2 }
 0x122   : > { %p807_p6 = pnand %p806_p5, %p800_p13 }
 0x124   : > { %810 = shalt.err (!%p807_p6)
}
 0x125   : > { %681 = dma.vmem_to_hbm [thread:$0]  (%p975_p4), %s1056_s12, 64, %s1054_s25, %s432_s1   ;;  %v395_v39 = vadd.f32 %v394_v38, %v312_v37  ;;  %v674_v40 = vpop.f32.mrb[5].mxu1  ;;  %v317_v41 = vpop.permute.xlu1 %316 }
 0x126   : > { %s479_s29 = sshll.u32 %s1047_s15, 4  ;;  %s654_s0 = sshll.u32 %s885_s21, 8  ;;  %v397_v42 = vpop.f32.mrb[6].mxu1  ;;  %s1111_s29 = int_to_ptr.vmem [resolvable:$true] %s479_s29 }
 0x127   : > { %v652_v43 = vpack.c.bf16 %v395_v39, %v395_v39  ;;  %v398_v44 = vadd.f32 %v397_v42, %v317_v41  ;;  %v675_v45 = vpop.f32.mrb[7].mxu1  ;;  %s1116_s17 = scalar_lea.hbm %s1174_s5, %s654_s0  ;;  %s811_s21 = scalar_lea.vmem %s1111_s29, 256 }
 0x128   : > { %p812_p7 = scmp.ne.s32.totalorder %s1111_s29, %s811_s21  ;;  %s900_s25 = smov [#allocation6]  }
 0x129   : > { %424 = vst.msk [vmem:[%s1047_s15 + $0x8] sm:$0xf] %vm402_vm2, %v652_v43  ;;  %v653_v46 = vpack.c.bf16 %v398_v44, %v398_v44  ;;  %s815_s12 = sshll.u32 %s900_s25, 4  ;;  %s816_s12 = int_to_ptr.vmem [resolvable:$false] %s815_s12 }
 0x12a   : > { %p813_p9 = pnand %p812_p7, %p975_p4  ;;  %s817_s7 = scalar_lea.vmem %s816_s12, 512 }
 0x12b   : > { %425 = vst.msk [vmem:[%s1047_s15 + $0xc] sm:$0xf] %vm402_vm2, %v653_v46  ;;  %p818_p11 = scmp.lt.s32.totalorder %s1111_s29, %s816_s12  ;;  %p819_p12 = scmp.lt.s32.totalorder %s817_s7, %s811_s21 }
 0x12c   : > { %p814_p10 = pneg %p813_p9 }
 0x12d   : > { %p820_p13 = por %p819_p12, %p818_p11 }
 0x12f   : > { %p821_p0 = pnand %p820_p13, %p814_p10 }
 0x131   : > { %824 = shalt.err (!%p821_p0)
}
 0x132   : > { %s825_s15 = scalar_lea.hbm %s1116_s17, 256  ;;  %s829_s24 = scalar_lea.hbm %s1174_s5, 512 }
 0x133   : > { %p826_p1 = scmp.ne.s32.totalorder %s1116_s17, %s825_s15  ;;  %p830_p5 = scmp.lt.u32.totalorder %s1116_s17, %s1174_s5 }
 0x134   : > { %p831_p6 = scmp.lt.u32.totalorder %s829_s24, %s825_s15  ;;  %p833_p9 = scmp.lt.u32.totalorder %s825_s15, %s1116_s17 }
 0x135   : > { %p827_p2 = pnand %p826_p1, %p975_p4 }
 0x136   : > { %p832_p7 = por %p831_p6, %p830_p5 }
 0x137   : > { %p828_p3 = pneg %p827_p2 }
 0x138   : > { %p834_p10 = por %p833_p9, %p832_p7 }
 0x13a   : > { %p835_p11 = pnand %p834_p10, %p828_p3 }
 0x13c   : > { %838 = shalt.err (!%p835_p11)
}
 0x13d   : > { %s901_s16 = smov 64   ;;  %s902_s0 = smov 4  }
 0x13e   : > { %682 = dma.vmem_to_hbm [thread:$0]  (%p975_p4), %s1111_s29, 256, %s1116_s17, %s432_s1, %s901_s16, %s901_s16, %s902_s0  }
 0x13f PF: > { %p696_p12 = scmp.ge.s32.totalorder %s893_s23, 2  ;;  %s494_s14 = sand.u32 1, %s873_s18  }
 0x140   : > { %s495_s27 = scalar_lea.sflag [#allocation3], %s494_s14 }
 0x141   : > { %p687_p13 = pnand %p696_p12, %p984_p8 }
 0x143   : > { %864 = dma.done.wait (!%p687_p13), %s495_s27, 64  }
 0x144   : > { %866 = vsyncadd (!%p687_p13), %s495_s27, 4294967232  ;;  %s1182_s21 = sadd.s32 4294967294, %s893_s23  }
 0x145   : > { %s503_s25 = sand.u32 1, %s1182_s21  }
 0x146   : > { %s504_s12 = scalar_lea.sflag [#allocation5], %s503_s25 }
 0x147   : > { %868 = dma.done.wait (!%p687_p13), %s504_s12, 320  }
 0x148   : > { %870 = vsyncadd (!%p687_p13), %s504_s12, 4294966976  ;;  %s22_s23 = sadd.s32 1, %s893_s23   ;;  %s1183_s18 = smov %s877_s19 }
 0x149   : > { %p19_p4 = scmp.ge.s32.totalorder %s22_s23, 4   ;;  %s1184_s19 = smov %s881_s20 }
 0x14a   : > { %s1185_s20 = smov %s990_s6  ;;  %s1186_s21 = smov %s889_s22 }
 0x14b   : > { %s1187_s22 = smov %s1189_s26  ;;  %21 = sbr.rel (!%p19_p4) target bundleno = 9 (0x9), region = 99 }
 0x152   :  { %518 = vsyncpa [#allocation3], 1 }
 0x153   :  { %520 = vsyncpa [#allocation3 + $0x1], 1 }
 0x154   :  { %521 = vsyncpa [#allocation5], 1 }
 0x155   :  { %523 = vsyncpa [#allocation5 + $0x1], 1 }

</bundles_post_ra>
